<compile_context>
chip_gen: v6e
topology: v6e:2x2x1
jax: 0.10.0
libtpu: 0.0.40
codegen_flags: <defaults>
</compile_context>

<pallas_src>
import functools

import jax
import jax.numpy as jnp
from jax.experimental import pallas as pl
from jax.experimental.pallas import tpu as pltpu


def _chan_stats_kernel(x_ref, o_ref, *, inv_c, inv_cm1):
    # x_ref block: (C, TILE) lane-dense; o_ref block: (4, TILE)
    xv = x_ref[...]                          # native dtype (bf16 max/min stays bf16)
    xf = xv.astype(jnp.float32)              # f32 for accumulation
    c = xv.shape[0]
    odt = o_ref.dtype

    if c == 1:
        # torch.std is unbiased: a single sample yields NaN.
        mean = xf
        std = jnp.full_like(mean, jnp.nan)
        mx = mn = xf
    else:
        ones = jnp.ones((1, c), jnp.float32)
        # Channel sums on the MXU (idle otherwise); max/min/square stay on the VPU.
        sm = jnp.dot(ones, xf, preferred_element_type=jnp.float32)        # (1, TILE)
        mean = sm * inv_c
        # Two-pass (centered) variance: better precision than sum-of-squares,
        # and the sum of squares is non-negative so no clamp is needed.
        centered = xf - mean
        sq = jnp.dot(ones, centered * centered,
                     preferred_element_type=jnp.float32)                  # (1, TILE)
        std = jnp.sqrt(sq * inv_cm1)
        mx = jnp.max(xv, axis=0, keepdims=True).astype(jnp.float32)
        mn = jnp.min(xv, axis=0, keepdims=True).astype(jnp.float32)

    # Direct row stores (no sublane concatenate / extra temp); channel order
    # matches torch.cat([max, std, mean, min], dim=1).
    o_ref[0:1, :] = mx.astype(odt)
    o_ref[1:2, :] = std.astype(odt)
    o_ref[2:3, :] = mean.astype(odt)
    o_ref[3:4, :] = mn.astype(odt)


def _vmem_capacity_bytes():
    try:
        return int(pltpu.get_tpu_info().vmem_capacity_bytes)
    except Exception:
        return 64 * 1024 * 1024          # assume the smallest part (v7x) if query fails


def _pick_tile(s, c, itemsize, budget_bytes, max_tile):
    """Choose the spatial tile (lane) width. Returns (tile, need_pad)."""
    # Per lane-column VMEM bytes for one grid step:
    #   2*C*itemsize   input double-buffer
    #   2*4*itemsize   output double-buffer
    #   ~2*C*4         in-kernel f32 temporaries (cast / centered^2)
    per_col = 2 * c * itemsize + 8 * itemsize + 2 * c * 4
    cap = max(128, (budget_bytes // per_col) // 128 * 128)
    if max_tile is not None:
        cap = max(128, min(cap, (max_tile // 128) * 128))
    if s <= cap:
        return s, False                 # single full-extent block, no (8,128) issue
    # Prefer the largest 128-multiple divisor of S -> exact grid, no padding.
    if s % 128 == 0:
        for t in range(cap, 127, -128):
            if s % t == 0:
                return t, False
    # Rare fallback: ragged spatial extent that doesn't fit one block -> pad input.
    return cap, True


def channel_pool_stats(x, *, max_tile=None, vmem_budget_bytes=None,
                       vmem_limit_bytes=None):
    """Equivalent of module_1.forward: per-pixel max/std/mean/min over channels."""
    n, c, h, w = x.shape
    s = h * w

    # Flatten spatial dims so the last (lane) dim is large and 128-friendly.
    xf = x.reshape(n, c, s)

    cap = _vmem_capacity_bytes()
    if vmem_limit_bytes is None:
        vmem_limit_bytes = cap * 3 // 4                          # 48 MiB v7x, 96 MiB v6e/v5e
    if vmem_budget_bytes is None:
        vmem_budget_bytes = min(int(cap * 0.55), 48 * 1024 * 1024)  # ~35 MiB v7x, 48 MiB v6e/v5e

    itemsize = jnp.dtype(x.dtype).itemsize
    tile, need_pad = _pick_tile(s, c, itemsize, vmem_budget_bytes, max_tile)

    if need_pad:
        s_pad = pl.cdiv(s, tile) * tile
        xf = jnp.pad(xf, ((0, 0), (0, 0), (0, s_pad - s)))
    else:
        s_pad = s

    inv_c = 1.0 / c
    inv_cm1 = 1.0 / (c - 1) if c > 1 else float("nan")   # unused when c == 1
    kernel = functools.partial(_chan_stats_kernel, inv_c=inv_c, inv_cm1=inv_cm1)

    out_flat = pl.pallas_call(
        kernel,
        out_shape=jax.ShapeDtypeStruct((n, 4, s_pad), x.dtype),
        grid_spec=pltpu.PrefetchScalarGridSpec(
            num_scalar_prefetch=0,
            grid=(n, s_pad // tile),
            in_specs=[
                pl.BlockSpec((pl.Squeezed(), c, tile), lambda i, j: (i, 0, j)),
            ],
            out_specs=pl.BlockSpec((pl.Squeezed(), 4, tile), lambda i, j: (i, 0, j)),
        ),
        compiler_params=pltpu.CompilerParams(
            dimension_semantics=("parallel", "parallel"),
            vmem_limit_bytes=vmem_limit_bytes,
        ),
    )(xf)

    if s_pad != s:
        out_flat = out_flat[:, :, :s]
    return out_flat.reshape(n, 4, h, w)


def _reference(x):
    # pure-JAX reference for verification (f32 math)
    xf = x.astype(jnp.float32)
    mx = jnp.max(xf, axis=1, keepdims=True)
    mn = jnp.min(xf, axis=1, keepdims=True)
    mean = jnp.mean(xf, axis=1, keepdims=True)
    std = jnp.std(xf, axis=1, keepdims=True, ddof=1)
    return jnp.concatenate([mx, std, mean, mn], axis=1)


if __name__ == "__main__":
    key = jax.random.PRNGKey(0)
    k1, k2, k3, k4, k5 = jax.random.split(key, 5)

    # 1) module-sized input (N=2, C=4, H=W=16): single full-extent spatial block
    x1 = jax.random.normal(k1, (2, 4, 16, 16), jnp.float32)
    o1 = jax.block_until_ready(channel_pool_stats(x1))
    assert o1.shape == (2, 4, 16, 16), o1.shape
    assert jnp.allclose(o1, _reference(x1), atol=1e-5, rtol=1e-5), "mismatch (case 1)"

    # 2) multi-tile spatial grid: S = 384 = 3 * 128, forced tile = 128
    x2 = jax.random.normal(k2, (2, 8, 16, 24), jnp.float32)
    o2 = jax.block_until_ready(channel_pool_stats(x2, max_tile=128))
    assert jnp.allclose(o2, _reference(x2), atol=1e-5, rtol=1e-5), "mismatch (case 2)"

    # 3) bf16 input, spatial extent not a multiple of 128 (single full block)
    x3 = jax.random.normal(k3, (2, 6, 8, 20), jnp.float32).astype(jnp.bfloat16)
    o3 = jax.block_until_ready(channel_pool_stats(x3))
    assert jnp.allclose(o3.astype(jnp.float32), _reference(x3),
                        atol=3e-2, rtol=3e-2), "mismatch (case 3)"

    # 4) ragged multi-tile fallback (S = 160 with tile = 128 -> padded tail)
    x4 = jax.random.normal(k4, (1, 5, 8, 20), jnp.float32)
    o4 = jax.block_until_ready(channel_pool_stats(x4, max_tile=128))
    assert jnp.allclose(o4, _reference(x4), atol=1e-5, rtol=1e-5), "mismatch (case 4)"

    # 5) C == 1: max/mean/min == x, std == NaN (torch unbiased-std semantics)
    x5 = jax.random.normal(k5, (2, 1, 4, 4), jnp.float32)
    o5 = jax.block_until_ready(channel_pool_stats(x5))
    assert bool(jnp.isnan(o5[:, 1]).all()), "C==1 std should be NaN"
    assert jnp.allclose(o5[:, 0], x5[:, 0]) and jnp.allclose(o5[:, 2], x5[:, 0]) \
        and jnp.allclose(o5[:, 3], x5[:, 0]), "mismatch (case 5)"

    print("KERNEL_OK")
</pallas_src>

<mosaic_0001>
module attributes {stable_mosaic.version = 11 : i64} {
  func.func @_chan_stats_kernel(%arg0: i32, %arg1: i32, %arg2: memref<1x4x256xf32, #tpu.memory_space<vmem>>, %arg3: memref<1x4x256xf32, #tpu.memory_space<vmem>>) attributes {dimension_semantics = [#tpu.dimension_semantics<parallel>, #tpu.dimension_semantics<parallel>], iteration_bounds = array<i64: 2, 1>, scalar_prefetch = 0 : i64, scratch_operands = 0 : i64, tpu.core_type = #tpu.core_type<tc>, window_params = [{transform_indices = @transform_0, window_bounds = array<i64: 1, 4, 256>}, {transform_indices = @transform_1, window_bounds = array<i64: 1, 4, 256>}]} {
    %c0 = arith.constant 0 : index
    %c0_0 = arith.constant 0 : index
    %c0_1 = arith.constant 0 : index
    %0 = vector.load %arg2[%c0, %c0_0, %c0_1] : memref<1x4x256xf32, #tpu.memory_space<vmem>>, vector<1x4x256xf32>
    %1 = vector.shape_cast %0 : vector<1x4x256xf32> to vector<4x256xf32>
    %cst = arith.constant 1.000000e+00 : f32
    %2 = vector.broadcast %cst : f32 to vector<1x4xf32>
    %cst_2 = arith.constant dense<0.000000e+00> : vector<1x256xf32>
    %3 = tpu.matmul %2, %1, %cst_2 {dimension_numbers = #tpu.dot_dimension_numbers<[1], [0], [0], [1], [0, 0, 1, 1], [], []>} : vector<1x4xf32>, vector<4x256xf32>, vector<1x256xf32> -> vector<1x256xf32>
    %cst_3 = arith.constant 2.500000e-01 : f32
    %4 = vector.broadcast %cst_3 : f32 to vector<1x256xf32>
    %5 = arith.mulf %3, %4 : vector<1x256xf32>
    %6 = vector.broadcast %5 : vector<1x256xf32> to vector<4x256xf32>
    %7 = arith.subf %1, %6 : vector<4x256xf32>
    %8 = arith.mulf %7, %7 : vector<4x256xf32>
    %cst_4 = arith.constant dense<0.000000e+00> : vector<1x256xf32>
    %9 = tpu.matmul %2, %8, %cst_4 {dimension_numbers = #tpu.dot_dimension_numbers<[1], [0], [0], [1], [0, 0, 1, 1], [], []>} : vector<1x4xf32>, vector<4x256xf32>, vector<1x256xf32> -> vector<1x256xf32>
    %cst_5 = arith.constant 0.333333343 : f32
    %10 = vector.broadcast %cst_5 : f32 to vector<1x256xf32>
    %11 = arith.mulf %9, %10 : vector<1x256xf32>
    %12 = math.sqrt %11 : vector<1x256xf32>
    %cst_6 = arith.constant dense<0xFF800000> : vector<256xf32>
    %13 = vector.multi_reduction <maximumf>, %1, %cst_6 [0] : vector<4x256xf32> to vector<256xf32>
    %14 = vector.shape_cast %13 : vector<256xf32> to vector<1x256xf32>
    %cst_7 = arith.constant dense<0x7F800000> : vector<256xf32>
    %15 = vector.multi_reduction <minimumf>, %1, %cst_7 [0] : vector<4x256xf32> to vector<256xf32>
    %16 = vector.shape_cast %15 : vector<256xf32> to vector<1x256xf32>
    %c0_8 = arith.constant 0 : index
    %c0_9 = arith.constant 0 : index
    %c0_10 = arith.constant 0 : index
    %17 = vector.load %arg3[%c0_8, %c0_9, %c0_10] : memref<1x4x256xf32, #tpu.memory_space<vmem>>, vector<1x1x256xf32>
    %18 = vector.shape_cast %17 : vector<1x1x256xf32> to vector<1x256xf32>
    %19 = vector.shape_cast %14 : vector<1x256xf32> to vector<1x1x256xf32>
    tpu.vector_store %arg3[%c0_8, %c0_9, %c0_10], %19 {strides = array<i32>} : memref<1x4x256xf32, #tpu.memory_space<vmem>>, vector<1x1x256xf32>,
    %c0_11 = arith.constant 0 : index
    %c1 = arith.constant 1 : index
    %c0_12 = arith.constant 0 : index
    %20 = vector.load %arg3[%c0_11, %c1, %c0_12] : memref<1x4x256xf32, #tpu.memory_space<vmem>>, vector<1x1x256xf32>
    %21 = vector.shape_cast %20 : vector<1x1x256xf32> to vector<1x256xf32>
    %22 = vector.shape_cast %12 : vector<1x256xf32> to vector<1x1x256xf32>
    tpu.vector_store %arg3[%c0_11, %c1, %c0_12], %22 {strides = array<i32>} : memref<1x4x256xf32, #tpu.memory_space<vmem>>, vector<1x1x256xf32>,
    %c0_13 = arith.constant 0 : index
    %c2 = arith.constant 2 : index
    %c0_14 = arith.constant 0 : index
    %23 = vector.load %arg3[%c0_13, %c2, %c0_14] : memref<1x4x256xf32, #tpu.memory_space<vmem>>, vector<1x1x256xf32>
    %24 = vector.shape_cast %23 : vector<1x1x256xf32> to vector<1x256xf32>
    %25 = vector.shape_cast %5 : vector<1x256xf32> to vector<1x1x256xf32>
    tpu.vector_store %arg3[%c0_13, %c2, %c0_14], %25 {strides = array<i32>} : memref<1x4x256xf32, #tpu.memory_space<vmem>>, vector<1x1x256xf32>,
    %c0_15 = arith.constant 0 : index
    %c3 = arith.constant 3 : index
    %c0_16 = arith.constant 0 : index
    %26 = vector.load %arg3[%c0_15, %c3, %c0_16] : memref<1x4x256xf32, #tpu.memory_space<vmem>>, vector<1x1x256xf32>
    %27 = vector.shape_cast %26 : vector<1x1x256xf32> to vector<1x256xf32>
    %28 = vector.shape_cast %16 : vector<1x256xf32> to vector<1x1x256xf32>
    tpu.vector_store %arg3[%c0_15, %c3, %c0_16], %28 {strides = array<i32>} : memref<1x4x256xf32, #tpu.memory_space<vmem>>, vector<1x1x256xf32>,
    return
  }
  func.func @transform_0(%arg0: i32, %arg1: i32) -> (i32, i32, i32) {
    %c0_i32 = arith.constant 0 : i32
    %c0_i32_0 = arith.constant 0 : i32
    return %arg0, %c0_i32, %arg1 : i32, i32, i32
  }
  func.func @transform_1(%arg0: i32, %arg1: i32) -> (i32, i32, i32) {
    %c0_i32 = arith.constant 0 : i32
    %c0_i32_0 = arith.constant 0 : i32
    return %arg0, %c0_i32, %arg1 : i32, i32, i32
  }
}

</mosaic_0001>

<bundles_post_ra>
// kernel: tpu_custom_call.1
= control target key start
LH: loop header
LB: loop body
LE: loop exit
PB: predicated region body
PF: predicated region fallthrough
CT: control target
= control target key end

     0   :  { %6 = vsyncpa [#allocation3], 0  ;;  %s956_s0 = inlined_call_operand.hbm [shape: f32[2,4,256], index: 0, kind: input, shape index: {}]   ;;  %s957_s1 = inlined_call_operand.hbm [shape: f32[2,4,256], index: 1, kind: output, shape index: {}]  }
   0x1   :  { %8 = vsyncpa [#allocation3 + $0x1], 0 }
   0x2   :  { %9 = vsyncpa [#allocation4], 0 }
   0x3   :  { %11 = vsyncpa [#allocation4 + $0x1], 0  ;;  %s779_s6 = smov 0   ;;  %s781_s7 = smov 0  }
   0x4   :  { %s783_s8 = smov 0   ;;  %s785_s9 = smov 0  }
   0x5   :  { %s787_s10 = smov 0   ;;  %s789_s11 = smov 0  }
   0x6 LB: > { %s558_s12 = sadd.s32 4294967295, %s762_s11   ;;  %s559_s13 = sadd.s32 4294967294, %s762_s11   ;;  %s762_s11 = sphi %s789_s11, %s17_s11   ;;  %s758_s10 = sphi %s787_s10, %s971_s10   ;;  %s754_s9 = sphi %s785_s9, %s970_s9   ;;  %s750_s8 = sphi %s783_s8, %s969_s8   ;;  %s746_s7 = sphi %s781_s7, %s968_s7   ;;  %s742_s6 = sphi %s779_s6, %s967_s6  }
   0x7   : > { %s29_s14 = sadd.s32 1, %s758_s10  ;;  %s38_s15 = sadd.s32 1, %s750_s8 }
   0x8   : > { %p31_p0 = scmp.ge.s32.totalorder %s29_s14, 2  ;;  %p45_p1 = scmp.ne.s32.totalorder %s750_s8, %s746_s7 }
   0x9   : > { %p46_p2 = scmp.eq.s32.totalorder %s762_s11, 0  ;;  %p51_p3 = scmp.ne.s32.totalorder %s746_s7, %s742_s6 }
   0xa   : > { %s973_s14 = smov (%p31_p0, %s29_s14), 0  ;;  %p52_p5 = scmp.eq.s32.totalorder %s558_s12, 0 }
   0xb   : > { %p820_p4 = por %p46_p2, %p45_p1  ;;  %s33_s17 = ssub.s32 %s758_s10, %s973_s14 }
   0xc   : > { %p77_p6 = scmp.eq.s32.totalorder %s558_s12, 1  ;;  %p36_p7 = scmp.eq.s32.totalorder %s33_s17, 0 }
   0xd   : > { %p826_p8 = por %p52_p5, %p51_p3  ;;  %p83_p10 = scmp.eq.s32.totalorder %s559_s13, 1 }
   0xe   : > { %p830_p9 = por %p77_p6, %p45_p1  ;;  %p596_p13 = scmp.lt.s32.totalorder %s762_s11, 2 }
   0xf   : > { %s835_s20 = scalar_select %p36_p7, %s750_s8, %s38_s15  }
  0x10   : > { %p837_p11 = por %p83_p10, %p51_p3  ;;  %s103_s22 = sand.u32 1, %s750_s8  }
  0x11   : > { %s562_s23 = sshll.u32 %s103_s22, 3  ;;  %s582_s24 = sshll.u32 %s758_s10, 7 }
  0x12   : > { %s961_s21 = scalar_select %p837_p11, 1, 0 }
  0x13   : > { %s115_s27 = scalar_lea.hbm %s956_s0, %s582_s24  ;;  %s107_s28 = scalar_lea.vmem [#allocation2], %s562_s23 }
  0x14   : > { %s117_s29 = sshll.u32 %s107_s28, 4  ;;  %p850_p0 = pnand %p596_p13, %p820_p4  ;;  %s118_s29 = int_to_ptr.vmem [resolvable:$true] %s117_s29 }
  0x15   : > { %p565_p1 = scmp.ge.s32.totalorder %s762_s11, 1  ;;  %p122_p2 = scmp.lt.s32.totalorder %s762_s11, 3 }
  0x16   : > { %s104_s2 = scalar_lea.sflag [#allocation3], %s103_s22  ;;  %p656_p3 = pneg %p850_p0 }
  0x17   : > { %s667_s3 = scalar_lea.vmem %s118_s29, 128  ;;  %s764_s4 = smov [#allocation2]  }
  0x18   : > { %p668_p5 = scmp.ne.s32.totalorder %s118_s29, %s667_s3  ;;  %s672_s5 = sshll.u32 %s764_s4, 4  ;;  %s673_s5 = int_to_ptr.vmem [resolvable:$false] %s672_s5 }
  0x19   : > { %s674_s12 = scalar_lea.vmem %s673_s5, 256  ;;  %p675_p10 = scmp.lt.s32.totalorder %s118_s29, %s673_s5 }
  0x1a   : > { %p670_p6 = pnand %p668_p5, %p656_p3  ;;  %p676_p12 = scmp.lt.s32.totalorder %s674_s12, %s667_s3 }
  0x1c   : > { %p671_p7 = pneg %p670_p6  ;;  %p677_p4 = por %p676_p12, %p675_p10 }
  0x1e   : > { %p678_p13 = pnand %p677_p4, %p671_p7 }
  0x20   : > { %681 = shalt.err (!%p678_p13)
}
  0x21   : > { %591 = dma.hbm_to_vmem [thread:$0]  (!%p850_p0), %s115_s27, 128, %s118_s29, %s104_s2  }
  0x22   : > { %p123_p11 = pnand %p565_p1, %p122_p2 }
  0x23   : > { %s865_s13 = sand.u32 (!%p123_p11), 1, %s746_s7  }
  0x24   : > { %126 = sbr.rel (%p123_p11) target bundleno = 490 (0x1ea), region = 24  ;;  %s566_s15 = sshll.u32 (!%p123_p11), %s865_s13, 3 }
  0x25   : > { %s129_s16 = scalar_lea.sflag (!%p123_p11), [#allocation3], %s865_s13  ;;  %s132_s17 = scalar_lea.vmem (!%p123_p11), [#allocation2], %s566_s15 }
  0x29   : > { %733 = dma.done.wait (%p826_p8), %s129_s16, 128  }
  0x2a   : > { %735 = vsyncadd (%p826_p8), %s129_s16, 4294967168  ;;  %v765_v0 = vmov 0.0   ;;  %v875_v1 = vld [vmem:[%s132_s17] sm:$0xff]  ;;  %vm160_vm0 = vcmask 1043456   ;;  %vm156_vm1 = vcmask 31744   ;;  %v766_v3 = vmov 1.0  }
  0x2b   : > { %229 = vmatprep.mubr.f32.mxu0 %v765_v0  ;;  %322 = vmatprep.mubr.f32.mxu1 %v765_v0  ;;  %v155_v2 = vcombine.high %v875_v1, %v875_v1  ;;  %v346_v4 = vsel %vm160_vm0, %v875_v1, -inf  ;;  %v360_v6 = vsel %vm160_vm0, %v875_v1, inf  ;;  %v238_v32 = vlaneseq  ;;  %s896_s18 = scalar_lea.vmem [#allocation5], %s566_s15  ;;  %s583_s22 = sshll.u32 %s754_s9, 7 }
  0x2c   : > { %v347_v8 = vrot.slane %v346_v4, 4  ;;  %v361_v10 = vrot.slane %v360_v6, 4  ;;  %v767_v33 = vmov 1966171168   ;;  %s474_s23 = sshll.u32 %s896_s18, 4  ;;  %s472_s26 = scalar_lea.hbm %s957_s1, %s583_s22  ;;  %s475_s23 = int_to_ptr.vmem [resolvable:$true] %s474_s23 }
  0x2d   : > { %568 = vmatprep.subr.msk.mxu0 %vm160_vm0, %v155_v2  ;;  %v353_v5 = vsel %vm160_vm0, %v155_v2, -inf  ;;  %v367_v7 = vsel %vm160_vm0, %v155_v2, inf  ;;  %v378_v34 = vunpack.c.l.s4 %v767_v33  ;;  %v239_v37 = vshrl.u32 %v238_v32, 7  ;;  %s458_s27 = scalar_lea.sflag [#allocation4], %s865_s13  ;;  %s682_s28 = scalar_lea.vmem %s475_s23, 128 }
  0x2e   : > { %569 = vmatpush1.msk.msra.mxu0 %vm160_vm0, %v875_v1  ;;  %v354_v9 = vrot.slane %v353_v5, 4  ;;  %v368_v11 = vrot.slane %v367_v7, 4  ;;  %v348_v12 = vmax.f32 %v346_v4, %v347_v8  ;;  %v362_v14 = vmin.f32 %v360_v6, %v361_v10  ;;  %p683_p8 = scmp.ne.s32.totalorder %s475_s23, %s682_s28  ;;  %s768_s29 = smov [#allocation5]  }
  0x2f   : > { %570 = vmatmul.mubr.msk.f32.vlgmr.msra.gmra.mxu0 %vm156_vm1, %v766_v3  ;;  %v379_v38 = vunpack.c.0.s8 %v378_v34  ;;  %vm890_vm2 = vcmp.lt.s32.totalorder %v238_v32, 256  ;;  %v240_v47 = vsub.s32 0, %v239_v37  ;;  %s686_s30 = sshll.u32 %s768_s29, 4  ;;  %s687_s30 = int_to_ptr.vmem [resolvable:$false] %s686_s30 }
  0x30   : > { %v355_v13 = vmax.f32 %v353_v5, %v354_v9  ;;  %v369_v15 = vmin.f32 %v367_v7, %v368_v11  ;;  %v349_v16 = vrot.slane %v348_v12, 2  ;;  %v363_v18 = vrot.slane %v362_v14, 2  ;;  %p684_p11 = pnand %p683_p8, %p830_p9  ;;  %s688_s9 = scalar_lea.vmem %s687_s30, 256 }
  0x31   : > { %v382_v39 = vsub.s32 %v379_v38, %v239_v37  ;;  %p689_p0 = scmp.lt.s32.totalorder %s475_s23, %s687_s30  ;;  %p690_p1 = scmp.lt.s32.totalorder %s688_s9, %s682_s28 }
  0x32   : > { %v356_v17 = vrot.slane %v355_v13, 2  ;;  %v370_v19 = vrot.slane %v369_v15, 2  ;;  %v350_v20 = vmax.f32 %v348_v12, %v349_v16  ;;  %v364_v22 = vmin.f32 %v362_v14, %v363_v18  ;;  %p685_p12 = pneg %p684_p11 }
  0x33   : > { %p691_p2 = por %p690_p1, %p689_p0 }
  0x34   : > { %v357_v21 = vmax.f32 %v355_v13, %v356_v17  ;;  %v371_v23 = vmin.f32 %v369_v15, %v370_v19  ;;  %v351_v24 = vrot.slane %v350_v20, 1  ;;  %v365_v26 = vrot.slane %v364_v22, 1 }
  0x35   : > { %p692_p3 = pnand %p691_p2, %p685_p12 }
  0x36   : > { %v358_v25 = vrot.slane %v357_v21, 1  ;;  %v372_v27 = vrot.slane %v371_v23, 1  ;;  %v352_v28 = vmax.f32 %v350_v20, %v351_v24  ;;  %v366_v30 = vmin.f32 %v364_v22, %v365_v26 }
  0x38   : > { %v359_v29 = vmax.f32 %v357_v21, %v358_v25  ;;  %v373_v31 = vmin.f32 %v371_v23, %v372_v27 }
  0x3a   : > { %v376_v35 = vcombine.low %v352_v28, %v359_v29  ;;  %v439_v36 = vcombine.low %v366_v30, %v373_v31 }
  0x3c   : > { %v383_v40 = vrot.slane %v376_v35, %v382_v39  ;;  %v446_v41 = vrot.slane %v439_v36, %v382_v39 }
  0x3e   : > { %v390_v42 = vrot.slane %v383_v40, %v382_v39  ;;  %v453_v43 = vrot.slane %v446_v41, %v382_v39 }
  0x40   : > { %396 = vst.msk [vmem:[%s896_s18] ss:$4 sm:$0x3] %vm890_vm2, %v390_v42  ;;  %576 = vst.msk [vmem:[%s896_s18 + $0x3] ss:$4 sm:$0x3] %vm890_vm2, %v453_v43 }
  0xef   : > { %v231_v45 = vpop.f32.mrf.mxu0 }
  0xf0   : > { %v236_v46 = vmul.f32 0.25, %v231_v45 }
  0xf1   : > { %v233_v48 = vpop.f32.mrf.mxu0 }
  0xf2   : > { %v237_v49 = vmul.f32 0.25, %v233_v48  ;;  %v241_v50 = vrot.slane %v236_v46, %v240_v47 }
  0xf4   : > { %v245_v51 = vrot.slane %v237_v49, %v240_v47  ;;  %v419_v52 = vcombine.low %v236_v46, %v237_v49 }
  0xf6   : > { %v248_v53 = vcombine.low %v241_v50, %v245_v51  ;;  %v426_v54 = vrot.slane %v419_v52, %v382_v39 }
  0xf8   : > { %v433_v55 = vrot.slane %v426_v54, %v382_v39  ;;  %v250_v56 = vsub.f32 %v875_v1, %v248_v53 }
  0xfa   : > { %575 = vst.msk [vmem:[%s896_s18 + $0x2] ss:$4 sm:$0x3] %vm890_vm2, %v433_v55  ;;  %v251_v57 = vmul.f32 %v250_v56, %v250_v56 }
  0xfc   : > { %v253_v58 = vcombine.high %v251_v57, %v251_v57 }
  0xfe   : > { %571 = vmatprep.subr.msk.mxu1 %vm160_vm0, %v253_v58 }
  0xff   : > { %572 = vmatpush1.msk.msra.mxu1 %vm160_vm0, %v251_v57 }
 0x100   : > { %573 = vmatmul.mubr.msk.f32.vlgmr.msra.gmra.mxu1 %vm156_vm1, %v766_v3 }
 0x1c0   : > { %v324_v59 = vpop.f32.mrf.mxu1 }
 0x1c1   : > { %v329_v60 = vmul.f32 0.33333334, %v324_v59 }
 0x1c2   : > { %v326_v61 = vpop.f32.mrf.mxu1 }
 0x1c3   : > { %650 = vrsqrt.f32 %v329_v60  ;;  %v330_v62 = vmul.f32 0.33333334, %v326_v61  ;;  %vm333_vm3 = vcmp.eq.f32.partialorder %v329_v60, inf  ;;  %v336_v5 = vand.u32 2147483648, %v329_v60 }
 0x1c4   : > { %vm335_vm5 = vcmp.eq.f32.partialorder %v329_v60, 0.0 }
 0x1c5   : > { %652 = vrsqrt.f32 %v330_v62  ;;  %vm340_vm4 = vcmp.eq.f32.partialorder %v330_v62, inf  ;;  %v343_v6 = vand.u32 2147483648, %v330_v62  ;;  %vm342_vm6 = vcmp.eq.f32.partialorder %v330_v62, 0.0 }
 0x1d0   : > { %v651_v63 = vpop.eup %650 }
 0x1d1   : > { %v332_v0 = vmul.f32 %v651_v63, %v329_v60 }
 0x1d2   : > { %v653_v1 = vpop.eup %652 }
 0x1d3   : > { %v334_v2 = vsel %vm333_vm3, %v329_v60, %v332_v0  ;;  %v339_v4 = vmul.f32 %v653_v1, %v330_v62 }
 0x1d4   : > { %v337_v7 = vsel %vm335_vm5, %v336_v5, %v334_v2 }
 0x1d5   : > { %v341_v3 = vsel %vm340_vm4, %v330_v62, %v339_v4 }
 0x1d6   : > { %v344_v8 = vsel %vm342_vm6, %v343_v6, %v341_v3 }
 0x1d7   : > { %v399_v9 = vcombine.low %v337_v7, %v344_v8 }
 0x1d9   : > { %v406_v10 = vrot.slane %v399_v9, %v382_v39 }
 0x1db   : > { %v413_v11 = vrot.slane %v406_v10, %v382_v39 }
 0x1dd   : > { %574 = vst.msk [vmem:[%s896_s18 + $0x1] ss:$4 sm:$0x3] %vm890_vm2, %v413_v11 }
 0x1de   : > { %695 = shalt.err (!%p692_p3)
}
 0x1df   : > { %s696_s2 = scalar_lea.hbm %s472_s26, 128  ;;  %s700_s5 = scalar_lea.hbm %s957_s1, 256 }
 0x1e0   : > { %p697_p5 = scmp.ne.s32.totalorder %s472_s26, %s696_s2  ;;  %p701_p10 = scmp.lt.s32.totalorder %s472_s26, %s957_s1 }
 0x1e1   : > { %p702_p4 = scmp.lt.s32.totalorder %s700_s5, %s696_s2 }
 0x1e2   : > { %p698_p6 = pnand %p697_p5, %p830_p9 }
 0x1e3   : > { %p703_p13 = por %p702_p4, %p701_p10 }
 0x1e4   : > { %p699_p7 = pneg %p698_p6 }
 0x1e6   : > { %p704_p8 = pnand %p703_p13, %p699_p7 }
 0x1e8   : > { %707 = shalt.err (!%p704_p8)
}
 0x1e9   : > { %586 = dma.vmem_to_hbm [thread:$0]  (%p830_p9), %s475_s23, 128, %s472_s26, %s458_s27  }
 0x1ea PF: > { %s486_s15 = sand.u32 1, %s742_s6   ;;  %p965_p11 = scmp.ne.s32.totalorder %s961_s21, 0 }
 0x1eb   : > { %p966_p12 = scmp.ge.s32.totalorder %s762_s11, 2  ;;  %s487_s16 = scalar_lea.sflag [#allocation4], %s486_s15 }
 0x1ed   : > { %p593_p0 = pnand %p966_p12, %p965_p11 }
 0x1ef   : > { %p594_p1 = pneg %p593_p0 }
 0x1f1   : > { %737 = dma.done.wait (%p594_p1), %s487_s16, 128  }
 0x1f2   : > { %739 = vsyncadd (%p594_p1), %s487_s16, 4294967168  ;;  %s17_s11 = sadd.s32 1, %s762_s11   ;;  %s967_s6 = smov %s746_s7 }
 0x1f3   : > { %p14_p2 = scmp.ge.s32.totalorder %s17_s11, 4   ;;  %s968_s7 = smov %s750_s8 }
 0x1f4   : > { %s969_s8 = smov %s835_s20  ;;  %s970_s9 = smov %s758_s10 }
 0x1f5   : > { %s971_s10 = smov %s973_s14  ;;  %16 = sbr.rel (!%p14_p2) target bundleno = 6 (0x6), region = 72 }
 0x1fa   :  { %492 = vsyncpa [#allocation3], 1 }
 0x1fb   :  { %494 = vsyncpa [#allocation3 + $0x1], 1 }
 0x1fc   :  { %495 = vsyncpa [#allocation4], 1 }
 0x1fd   :  { %497 = vsyncpa [#allocation4 + $0x1], 1 }

</bundles_post_ra>
